<compile_context>
chip_gen: v7x
topology: tpu7x:2x2x1
jax: 0.10.0
libtpu: 0.0.40
codegen_flags: <defaults>
</compile_context>

<pallas_src>
import math
import functools
import numpy as np
import jax
import jax.numpy as jnp
from jax.experimental import pallas as pl
from jax.experimental.pallas import tpu as pltpu


def _round_up(x, m):
    return ((x + m - 1) // m) * m


# ---------------------------------------------------------------------------
# One-time (init) parameter setup: expand ConvTranspose2d -> dense matrix and
# fold the fc layer into the first ConvT operator. Host-side, runs once.
# ---------------------------------------------------------------------------
def convtranspose2d_as_dense(w, b, h_in, w_in, stride=2, pad=1, out_pad=1):
    """Exact dense operator of torch.nn.ConvTranspose2d(k=3, s=2, p=1, op=1).

    w: (C_in, C_out, K, K), b: (C_out,)
    Returns M of shape (C_in*H_in*W_in, C_out*H_out*W_out), flattened bias,
    and the output (C_out, H_out, W_out) shape.
    """
    w = np.asarray(jax.device_get(w), np.float32)
    b = np.asarray(jax.device_get(b), np.float32)
    c_in, c_out, k, _ = w.shape
    h_out = (h_in - 1) * stride - 2 * pad + k + out_pad
    w_out = (w_in - 1) * stride - 2 * pad + k + out_pad
    m = np.zeros((c_in * h_in * w_in, c_out * h_out * w_out), np.float32)
    for ci in range(c_in):
        for hi in range(h_in):
            for wi in range(w_in):
                row = (ci * h_in + hi) * w_in + wi
                for co in range(c_out):
                    for kh in range(k):
                        ho = hi * stride - pad + kh
                        if not (0 <= ho < h_out):
                            continue
                        for kw in range(k):
                            wo = wi * stride - pad + kw
                            if not (0 <= wo < w_out):
                                continue
                            col = (co * h_out + ho) * w_out + wo
                            m[row, col] += w[ci, co, kh, kw]
    bias_full = np.repeat(b, h_out * w_out).astype(np.float32)
    return m, bias_full, (c_out, h_out, w_out)


def build_decoder_params(wfc, bfc, w1, b1, w2, b2, shape_before_flatten):
    """Build (once, at init) the fused dense operators used by the kernel."""
    c0, h0, w0 = shape_before_flatten
    m1, b1_full, (c1, h1, w1sp) = convtranspose2d_as_dense(w1, b1, h0, w0)
    m2, b2_full, (c2, h2, w2sp) = convtranspose2d_as_dense(w2, b2, h1, w1sp)

    wfc_np = np.asarray(jax.device_get(wfc), np.float32)   # (F0, E)
    bfc_np = np.asarray(jax.device_get(bfc), np.float32)   # (F0,)

    # Fold fc into convT1 (exact: no nonlinearity between them).
    w01 = wfc_np.T @ m1                                     # (E, F1)
    b01 = bfc_np @ m1 + b1_full                             # (F1,)

    arrays = dict(
        w01=jnp.asarray(w01, jnp.bfloat16),                 # bf16 MXU weights
        b01=jnp.asarray(b01, jnp.float32).reshape(1, -1),   # f32 bias
        m2=jnp.asarray(m2, jnp.bfloat16),
        b2=jnp.asarray(b2_full, jnp.float32).reshape(1, -1),
    )
    return arrays, (c2, h2, w2sp)


# ---------------------------------------------------------------------------
# Pallas kernel: one batch tile -> two MXU matmuls + f32 bias/ReLU/sigmoid.
# ---------------------------------------------------------------------------
def _decoder_kernel(x_ref, w01_ref, b01_ref, m2_ref, b2_ref, o_ref):
    # Fused fc + ConvT1: bf16 MXU inputs, f32 accumulation.
    h = jnp.dot(x_ref[...].astype(jnp.bfloat16), w01_ref[...],
                preferred_element_type=jnp.float32)
    h = jnp.maximum(h + b01_ref[...], 0.0)                  # f32 bias + ReLU (VPU)
    # ConvT2 as dense matmul: bf16 MXU inputs, f32 accumulation.
    h = jnp.dot(h.astype(jnp.bfloat16), m2_ref[...],
                preferred_element_type=jnp.float32)
    h = h + b2_ref[...]
    # Sigmoid: exp and approx reciprocal both take the EUP slot (VALU stays free).
    o_ref[...] = pl.reciprocal(1.0 + jnp.exp(-h), approx=True)


def decoder_pallas(x, arrays, out_chw, tile_n=128):
    """Forward pass equivalent to the PyTorch Decoder.forward. Returns NCHW."""
    n, e = x.shape
    c2, h2, w2sp = out_chw
    f1 = arrays["w01"].shape[1]
    f2 = arrays["m2"].shape[1]

    # Pad batch (sublane) dim to a multiple of 8 and of the batch tile so
    # vregs/stores are unmasked; slice the padding back off at the end.
    tile_n = min(tile_n, _round_up(n, 8))
    n_pad = _round_up(n, tile_n)
    if n_pad != n:
        x = jnp.pad(x, ((0, n_pad - n), (0, 0)))

    grid = (n_pad // tile_n,)
    flops = 2 * n_pad * (e * f1 + f1 * f2)
    bytes_accessed = (n_pad * e * 4                     # x
                      + arrays["w01"].size * 2          # bf16 weights
                      + arrays["m2"].size * 2
                      + (f1 + f2) * 4                   # biases
                      + n_pad * f2 * 4)                 # output

    out_flat = pl.pallas_call(
        _decoder_kernel,
        out_shape=jax.ShapeDtypeStruct((n_pad, f2), jnp.float32),
        grid=grid,
        in_specs=[
            pl.BlockSpec((tile_n, e), lambda i: (i, 0)),   # batch-tiled input
            pl.BlockSpec((e, f1), lambda i: (0, 0)),       # weights stay resident
            pl.BlockSpec((1, f1), lambda i: (0, 0)),
            pl.BlockSpec((f1, f2), lambda i: (0, 0)),
            pl.BlockSpec((1, f2), lambda i: (0, 0)),
        ],
        out_specs=pl.BlockSpec((tile_n, f2), lambda i: (i, 0)),
        compiler_params=pltpu.CompilerParams(
            dimension_semantics=("parallel",)),            # megacore / 2 TCs
        cost_estimate=pl.CostEstimate(
            flops=flops,
            transcendentals=2 * n_pad * f2,                # exp + recip
            bytes_accessed=bytes_accessed),
    )(x, arrays["w01"], arrays["b01"], arrays["m2"], arrays["b2"])

    return out_flat[:n].reshape(n, c2, h2, w2sp)


# ---------------------------------------------------------------------------
# Pure-JAX reference (PyTorch semantics) for a correctness check.
# ---------------------------------------------------------------------------
def decoder_reference(x, wfc, bfc, w1, b1, w2, b2, shape_before_flatten):
    n = x.shape[0]
    h = x @ wfc.T + bfc
    h = h.reshape(n, *shape_before_flatten)

    def convT(inp, w, b):
        # ConvTranspose2d(k=3, s=2, p=1, output_padding=1) via dilated conv.
        wr = jnp.flip(w, axis=(2, 3)).transpose(1, 0, 2, 3)  # (Cout, Cin, K, K)
        out = jax.lax.conv_general_dilated(
            inp, wr, window_strides=(1, 1), padding=((1, 2), (1, 2)),
            lhs_dilation=(2, 2), dimension_numbers=("NCHW", "OIHW", "NCHW"))
        return out + b[None, :, None, None]

    h = jax.nn.relu(convT(h, w1, b1))
    return jax.nn.sigmoid(convT(h, w2, b2))


if __name__ == "__main__":
    # Small shapes consistent with the module:
    #   embedding_size=32, shape_before_flatten=(8,4,4),
    #   channels=(4,8) (reversed inside the module -> (8,4)),
    #   image_size=(16,16,1), batch=2.
    embedding_size = 32
    shape_before_flatten = (8, 4, 4)
    channels = (4, 8)
    image_size = (16, 16, 1)
    batch = 2

    c_rev = channels[::-1]                # (8, 4)
    h_out, w_out, channels_out = image_size
    f0 = math.prod(shape_before_flatten)  # 128

    key = jax.random.PRNGKey(0)
    k_fc_w, k_fc_b, k_c1_w, k_c1_b, k_c2_w, k_c2_b, k_x = jax.random.split(key, 7)

    # Deterministic PyTorch-style uniform init (shapes match nn.Linear / ConvTranspose2d).
    lim_fc = 1.0 / math.sqrt(embedding_size)
    wfc = jax.random.uniform(k_fc_w, (f0, embedding_size), jnp.float32, -lim_fc, lim_fc)
    bfc = jax.random.uniform(k_fc_b, (f0,), jnp.float32, -lim_fc, lim_fc)

    lim1 = 1.0 / math.sqrt(c_rev[0] * 3 * 3)
    w1 = jax.random.uniform(k_c1_w, (c_rev[0], c_rev[1], 3, 3), jnp.float32, -lim1, lim1)
    b1 = jax.random.uniform(k_c1_b, (c_rev[1],), jnp.float32, -lim1, lim1)

    lim2 = 1.0 / math.sqrt(c_rev[1] * 3 * 3)
    w2 = jax.random.uniform(k_c2_w, (c_rev[1], channels_out, 3, 3), jnp.float32, -lim2, lim2)
    b2 = jax.random.uniform(k_c2_b, (channels_out,), jnp.float32, -lim2, lim2)

    x = jax.random.normal(k_x, (batch, embedding_size), jnp.float32)

    # One-time init: build fused dense operators (host side), cache on device.
    arrays, out_chw = build_decoder_params(
        wfc, bfc, w1, b1, w2, b2, shape_before_flatten)

    out = decoder_pallas(x, arrays, out_chw)
    out = jax.block_until_ready(out)
    assert out.shape == (batch, channels_out, h_out, w_out), out.shape

    ref = jax.block_until_ready(
        decoder_reference(x, wfc, bfc, w1, b1, w2, b2, shape_before_flatten))
    np.testing.assert_allclose(np.asarray(out), np.asarray(ref), rtol=2e-2, atol=2e-2)

    print("KERNEL_OK")
</pallas_src>

<mosaic_0001>
module attributes {stable_mosaic.version = 11 : i64} {
  func.func @_decoder_kernel(%arg0: i32, %arg1: memref<8x32xf32, #tpu.memory_space<vmem>>, %arg2: memref<32x256xbf16, #tpu.memory_space<vmem>>, %arg3: memref<1x256xf32, #tpu.memory_space<vmem>>, %arg4: memref<256x256xbf16, #tpu.memory_space<vmem>>, %arg5: memref<1x256xf32, #tpu.memory_space<vmem>>, %arg6: memref<8x256xf32, #tpu.memory_space<vmem>>) attributes {dimension_semantics = [#tpu.dimension_semantics<parallel>], iteration_bounds = array<i64: 1>, scalar_prefetch = 0 : i64, scratch_operands = 0 : i64, tpu.core_type = #tpu.core_type<tc>, window_params = [{transform_indices = @transform_0, window_bounds = array<i64: 8, 32>}, {pipeline_mode = #tpu.pipeline_mode<synchronous>, transform_indices = @transform_1, window_bounds = array<i64: 32, 256>}, {pipeline_mode = #tpu.pipeline_mode<synchronous>, transform_indices = @transform_2, window_bounds = array<i64: 1, 256>}, {pipeline_mode = #tpu.pipeline_mode<synchronous>, transform_indices = @transform_3, window_bounds = array<i64: 256, 256>}, {pipeline_mode = #tpu.pipeline_mode<synchronous>, transform_indices = @transform_4, window_bounds = array<i64: 1, 256>}, {transform_indices = @transform_5, window_bounds = array<i64: 8, 256>}]} {
    %c0 = arith.constant 0 : index
    %c0_0 = arith.constant 0 : index
    %0 = vector.load %arg1[%c0, %c0_0] : memref<8x32xf32, #tpu.memory_space<vmem>>, vector<8x32xf32>
    %1 = arith.truncf %0 : vector<8x32xf32> to vector<8x32xbf16>
    %c0_1 = arith.constant 0 : index
    %c0_2 = arith.constant 0 : index
    %2 = vector.load %arg2[%c0_1, %c0_2] : memref<32x256xbf16, #tpu.memory_space<vmem>>, vector<32x256xbf16>
    %cst = arith.constant dense<0.000000e+00> : vector<8x256xf32>
    %3 = tpu.matmul %1, %2, %cst {dimension_numbers = #tpu.dot_dimension_numbers<[1], [0], [0], [1], [0, 0, 1, 1], [], []>} : vector<8x32xbf16>, vector<32x256xbf16>, vector<8x256xf32> -> vector<8x256xf32>
    %c0_3 = arith.constant 0 : index
    %c0_4 = arith.constant 0 : index
    %4 = vector.load %arg3[%c0_3, %c0_4] : memref<1x256xf32, #tpu.memory_space<vmem>>, vector<1x256xf32>
    %5 = vector.broadcast %4 : vector<1x256xf32> to vector<8x256xf32>
    %6 = arith.addf %3, %5 : vector<8x256xf32>
    %cst_5 = arith.constant 0.000000e+00 : f32
    %7 = vector.broadcast %cst_5 : f32 to vector<8x256xf32>
    %8 = arith.maximumf %6, %7 : vector<8x256xf32>
    %9 = arith.truncf %8 : vector<8x256xf32> to vector<8x256xbf16>
    %c0_6 = arith.constant 0 : index
    %c0_7 = arith.constant 0 : index
    %10 = vector.load %arg4[%c0_6, %c0_7] : memref<256x256xbf16, #tpu.memory_space<vmem>>, vector<256x256xbf16>
    %cst_8 = arith.constant dense<0.000000e+00> : vector<8x256xf32>
    %11 = tpu.matmul %9, %10, %cst_8 {dimension_numbers = #tpu.dot_dimension_numbers<[1], [0], [0], [1], [0, 0, 1, 1], [], []>} : vector<8x256xbf16>, vector<256x256xbf16>, vector<8x256xf32> -> vector<8x256xf32>
    %c0_9 = arith.constant 0 : index
    %c0_10 = arith.constant 0 : index
    %12 = vector.load %arg5[%c0_9, %c0_10] : memref<1x256xf32, #tpu.memory_space<vmem>>, vector<1x256xf32>
    %13 = vector.broadcast %12 : vector<1x256xf32> to vector<8x256xf32>
    %14 = arith.addf %11, %13 : vector<8x256xf32>
    %cst_11 = arith.constant 0.000000e+00 : f32
    %15 = vector.broadcast %cst_11 : f32 to vector<8x256xf32>
    %16 = arith.subf %15, %14 : vector<8x256xf32>
    %17 = math.exp %16 : vector<8x256xf32>
    %cst_12 = arith.constant 1.000000e+00 : f32
    %18 = vector.broadcast %cst_12 : f32 to vector<8x256xf32>
    %19 = arith.addf %18, %17 : vector<8x256xf32>
    %20 = tpu.reciprocal %19 {approx = true} : vector<8x256xf32> -> vector<8x256xf32>
    %c0_13 = arith.constant 0 : index
    %c0_14 = arith.constant 0 : index
    %21 = vector.load %arg6[%c0_13, %c0_14] : memref<8x256xf32, #tpu.memory_space<vmem>>, vector<8x256xf32>
    tpu.vector_store %arg6[%c0_13, %c0_14], %20 {strides = array<i32>} : memref<8x256xf32, #tpu.memory_space<vmem>>, vector<8x256xf32>,
    return
  }
  func.func @transform_0(%arg0: i32) -> (i32, i32) {
    %c0_i32 = arith.constant 0 : i32
    %c0_i32_0 = arith.constant 0 : i32
    return %arg0, %c0_i32 : i32, i32
  }
  func.func @transform_1(%arg0: i32) -> (i32, i32) {
    %c0_i32 = arith.constant 0 : i32
    %c0_i32_0 = arith.constant 0 : i32
    %c0_i32_1 = arith.constant 0 : i32
    return %c0_i32, %c0_i32_0 : i32, i32
  }
  func.func @transform_2(%arg0: i32) -> (i32, i32) {
    %c0_i32 = arith.constant 0 : i32
    %c0_i32_0 = arith.constant 0 : i32
    %c0_i32_1 = arith.constant 0 : i32
    return %c0_i32, %c0_i32_0 : i32, i32
  }
  func.func @transform_3(%arg0: i32) -> (i32, i32) {
    %c0_i32 = arith.constant 0 : i32
    %c0_i32_0 = arith.constant 0 : i32
    %c0_i32_1 = arith.constant 0 : i32
    return %c0_i32, %c0_i32_0 : i32, i32
  }
  func.func @transform_4(%arg0: i32) -> (i32, i32) {
    %c0_i32 = arith.constant 0 : i32
    %c0_i32_0 = arith.constant 0 : i32
    %c0_i32_1 = arith.constant 0 : i32
    return %c0_i32, %c0_i32_0 : i32, i32
  }
  func.func @transform_5(%arg0: i32) -> (i32, i32) {
    %c0_i32 = arith.constant 0 : i32
    %c0_i32_0 = arith.constant 0 : i32
    return %arg0, %c0_i32 : i32, i32
  }
}

</mosaic_0001>

<bundles_post_ra>
// kernel: tpu_custom_call.1
= control target key start
LH: loop header
LB: loop body
LE: loop exit
PB: predicated region body
PF: predicated region fallthrough
CT: control target
= control target key end

     0   :  { %10 = vsyncpa [#allocation3], 0  ;;  %s718_s0 = inlined_call_operand.hbm [shape: f32[8,32], index: 0, kind: input, shape index: {}]   ;;  %s719_s1 = inlined_call_operand.hbm [shape: bf16[32,256], index: 1, kind: input, shape index: {}]   ;;  %s720_s2 = inlined_call_operand.vmem [shape: f32[1,256], index: 2, kind: input, shape index: {}]   ;;  %s721_s3 = inlined_call_operand.hbm [shape: bf16[256,256], index: 3, kind: input, shape index: {}]   ;;  %s722_s4 = inlined_call_operand.vmem [shape: f32[1,256], index: 4, kind: input, shape index: {}]   ;;  %s723_s5 = inlined_call_operand.hbm [shape: f32[8,256], index: 5, kind: output, shape index: {}]  }
   0x1   :  { %11 = vsyncpa [#allocation6], 0 }
   0x2   :  { %12 = vsyncpa [#allocation4], 0  ;;  %s621_s18 = smov [#allocation5]   ;;  %s527_s22 = scalar_lea.hbm %s719_s1, 512 }
   0x3   :  { %s28_s19 = sshll.u32 %s621_s18, 4  ;;  %p528_p0 = scmp.ne.s32.totalorder %s719_s1, %s527_s22  ;;  %s29_s19 = int_to_ptr.vmem [resolvable:$true] %s28_s19 }
   0x4   :  { %p531_p1 = scmp.lt.u32.totalorder %s527_s22, %s719_s1 }
   0x6   :  { %p533_p2 = pnand %p531_p1, %p528_p0 }
   0x8   :  { %536 = shalt.err (!%p533_p2)
}
   0x9   :  { %s537_s27 = scalar_lea.vmem %s29_s19, 512  ;;  %p542_p4 = scmp.lt.s32.totalorder %s29_s19, %s29_s19 }
   0xa   :  { %p538_p3 = scmp.ne.s32.totalorder %s29_s19, %s537_s27  ;;  %p543_p5 = scmp.lt.s32.totalorder %s537_s27, %s537_s27 }
   0xc   :  { %p544_p6 = por %p543_p5, %p542_p4 }
   0xe   :  { %p545_p7 = pnand %p544_p6, %p538_p3 }
  0x10   :  { %548 = shalt.err (!%p545_p7)
}
  0x11   :  { %s622_s28 = smov 128   ;;  %s623_s29 = smov 8  }
  0x12   :  { %34 = dma.hbm_to_vmem [thread:$0]  %s719_s1, 512, %s29_s19, [#allocation6], %s622_s28, %s622_s28, %s623_s29  }
  0x13   :  { %s624_s7 = smov [#allocation2]   ;;  %s625_s9 = smov [#allocation7]  }
  0x14   :  { %s19_s8 = sshll.u32 %s624_s7, 4  ;;  %s42_s10 = sshll.u32 %s625_s9, 4  ;;  %s20_s8 = int_to_ptr.vmem [resolvable:$true] %s19_s8  ;;  %s43_s10 = int_to_ptr.vmem [resolvable:$true] %s42_s10 }
  0x15   :  { %s549_s13 = scalar_lea.hbm %s718_s0, 128 }
  0x16   :  { %p550_p8 = scmp.ne.s32.totalorder %s718_s0, %s549_s13  ;;  %p553_p9 = scmp.lt.u32.totalorder %s549_s13, %s718_s0 }
  0x18   :  { %p555_p10 = pnand %p553_p9, %p550_p8 }
  0x1a   :  { %558 = shalt.err (!%p555_p10)
}
  0x1b   :  { %s559_s1 = scalar_lea.vmem %s20_s8, 128  ;;  %p564_p12 = scmp.lt.s32.totalorder %s20_s8, %s20_s8 }
  0x1c   :  { %p560_p11 = scmp.ne.s32.totalorder %s20_s8, %s559_s1  ;;  %p565_p13 = scmp.lt.s32.totalorder %s559_s1, %s559_s1 }
  0x1e   :  { %p566_p0 = por %p565_p13, %p564_p12 }
  0x20   :  { %p567_p1 = pnand %p566_p0, %p560_p11 }
  0x22   :  { %570 = shalt.err (!%p567_p1)
}
  0x23   :  { %22 = dma.hbm_to_vmem [thread:$0]  %s718_s0, 128, %s20_s8, [#allocation3]  }
  0x24   :  { %s571_s22 = scalar_lea.hbm %s721_s3, 4096 }
  0x25   :  { %p572_p2 = scmp.ne.s32.totalorder %s721_s3, %s571_s22  ;;  %p575_p3 = scmp.lt.u32.totalorder %s571_s22, %s721_s3 }
  0x27   :  { %p577_p4 = pnand %p575_p3, %p572_p2 }
  0x29   :  { %580 = shalt.err (!%p577_p4)
}
  0x2a   :  { %s581_s27 = scalar_lea.vmem %s43_s10, 4096  ;;  %p586_p6 = scmp.lt.s32.totalorder %s43_s10, %s43_s10 }
  0x2b   :  { %p582_p5 = scmp.ne.s32.totalorder %s43_s10, %s581_s27  ;;  %p587_p7 = scmp.lt.s32.totalorder %s581_s27, %s581_s27 }
  0x2d   :  { %p588_p8 = por %p587_p7, %p586_p6 }
  0x2f   :  { %p589_p9 = pnand %p588_p8, %p582_p5 }
  0x31   :  { %592 = shalt.err (!%p589_p9)
}
  0x32   :  { %48 = dma.hbm_to_vmem [thread:$0]  %s721_s3, 4096, %s43_s10, [#allocation6], %s622_s28, %s622_s28, %s623_s29  }
  0x33   :  { %615 = dma.done.wait [#allocation3], 128  }
  0x34   :  { %616 = vsyncadd [#allocation3], 4294967168 }
  0x35   :  { %617 = dma.done.wait [#allocation6], 4608  }
  0x36   :  { %618 = vsyncadd [#allocation6], 4294962688  ;;  %v626_v0 = vmov 0   ;;  %v465_v1 = vld [vmem:[#allocation5 + $0x4] ss:$8 sps:$4 sm:$0xff]   ;;  %v61_v5 = vld [vmem:[#allocation2] sm:$0xff]  ;;  %v69_v39 = vlaneseq }
  0x37   :  { %135 = vmatprep.mubr.bf16.mxu0 %v626_v0  ;;  %v467_v2 = vld [vmem:[#allocation5] ss:$8 sps:$4 sm:$0xff]   ;;  %103 = vmatprep.subr.bf16.mxu0 %v465_v1  ;;  %v468_v3 = vld [vmem:[#allocation5 + $0x14] ss:$8 sps:$4 sm:$0xff]   ;;  %v470_v4 = vld [vmem:[#allocation5 + $0x10] ss:$8 sps:$4 sm:$0xff]   ;;  %v62_v9 = vpack.c.bf16 %v61_v5, %v61_v5 }
  0x38   :  { %104 = vmatpush1.bf16.msra.mxu0 %v467_v2  ;;  %v471_v6 = vld [vmem:[#allocation7 + $0x4] ss:$8 sps:$4 sm:$0xff]   ;;  %v473_v7 = vld [vmem:[#allocation7] ss:$8 sps:$4 sm:$0xff]   ;;  %v474_v8 = vld [vmem:[#allocation7 + $0x14] ss:$8 sps:$4 sm:$0xff]  }
  0x39   :  { %105 = vmatprep.subr.bf16.mxu0 %v468_v3  ;;  %352 = vmatprep.subr.bf16.mxu1 %v471_v6  ;;  %v476_v10 = vld [vmem:[#allocation7 + $0x10] ss:$8 sps:$4 sm:$0xff]   ;;  %vm99_vm0 = vcmask 261120   ;;  %v477_v11 = vld [vmem:[#allocation7 + $0x24] ss:$8 sps:$4 sm:$0xff]   ;;  %v70_v40 = vshrl.u32 %v69_v39, 7 }
  0x3a   :  { %353 = vmatpush1.bf16.msra.mxu1 %v473_v7  ;;  %v479_v12 = vld [vmem:[#allocation7 + $0x20] ss:$8 sps:$4 sm:$0xff]   ;;  %v480_v13 = vld [vmem:[#allocation7 + $0x34] ss:$8 sps:$4 sm:$0xff]   ;;  %v482_v14 = vld [vmem:[#allocation7 + $0x30] ss:$8 sps:$4 sm:$0xff]  }
  0x3b   :  { %354 = vmatprep.subr.bf16.mxu1 %v474_v8  ;;  %v483_v15 = vld [vmem:[#allocation7 + $0x44] ss:$8 sps:$4 sm:$0xff]   ;;  %v485_v16 = vld [vmem:[#allocation7 + $0x40] ss:$8 sps:$4 sm:$0xff]   ;;  %v486_v17 = vld [vmem:[#allocation7 + $0x54] ss:$8 sps:$4 sm:$0xff]  }
  0x3c   :  { %106 = vmatpush1.bf16.msra.mxu0 %v470_v4  ;;  %v488_v18 = vld [vmem:[#allocation7 + $0x50] ss:$8 sps:$4 sm:$0xff]   ;;  %v489_v19 = vld [vmem:[#allocation7 + $0x64] ss:$8 sps:$4 sm:$0xff]   ;;  %v491_v20 = vld [vmem:[#allocation7 + $0x60] ss:$8 sps:$4 sm:$0xff]  }
  0x3d   :  { %v492_v21 = vld [vmem:[#allocation7 + $0x74] ss:$8 sps:$4 sm:$0xff]   ;;  %v494_v22 = vld [vmem:[#allocation7 + $0x70] ss:$8 sps:$4 sm:$0xff]   ;;  %v495_v23 = vld [vmem:[#allocation7 + $0x84] ss:$8 sps:$4 sm:$0xff]  }
  0x3e   :  { %355 = vmatpush1.bf16.msra.mxu1 %v476_v10  ;;  %v497_v24 = vld [vmem:[#allocation7 + $0x80] ss:$8 sps:$4 sm:$0xff]   ;;  %v498_v25 = vld [vmem:[#allocation7 + $0x94] ss:$8 sps:$4 sm:$0xff]   ;;  %v500_v26 = vld [vmem:[#allocation7 + $0x90] ss:$8 sps:$4 sm:$0xff]  }
  0x3f   :  { %425 = vmatmul.mubr.msk.bf16.vlgmr.msra.gmra.mrb[0].mxu0 %vm99_vm0, %v62_v9  ;;  %356 = vmatprep.subr.bf16.mxu1 %v477_v11  ;;  %v501_v27 = vld [vmem:[#allocation7 + $0xa4] ss:$8 sps:$4 sm:$0xff]   ;;  %v503_v28 = vld [vmem:[#allocation7 + $0xa0] ss:$8 sps:$4 sm:$0xff]   ;;  %v504_v29 = vld [vmem:[#allocation7 + $0xb4] ss:$8 sps:$4 sm:$0xff]  }
  0x40   :  { %v506_v30 = vld [vmem:[#allocation7 + $0xb0] ss:$8 sps:$4 sm:$0xff]   ;;  %v507_v31 = vld [vmem:[#allocation7 + $0xc4] ss:$8 sps:$4 sm:$0xff]   ;;  %v509_v32 = vld [vmem:[#allocation7 + $0xc0] ss:$8 sps:$4 sm:$0xff]  }
  0x41   :  { %v510_v33 = vld [vmem:[#allocation7 + $0xd4] ss:$8 sps:$4 sm:$0xff]   ;;  %v512_v34 = vld [vmem:[#allocation7 + $0xd0] ss:$8 sps:$4 sm:$0xff]   ;;  %v513_v35 = vld [vmem:[#allocation7 + $0xe4] ss:$8 sps:$4 sm:$0xff]  }
  0x42   :  { %357 = vmatpush1.bf16.msra.mxu1 %v479_v12  ;;  %v515_v36 = vld [vmem:[#allocation7 + $0xe0] ss:$8 sps:$4 sm:$0xff]   ;;  %v516_v37 = vld [vmem:[#allocation7 + $0xf4] ss:$8 sps:$4 sm:$0xff]   ;;  %v518_v38 = vld [vmem:[#allocation7 + $0xf0] ss:$8 sps:$4 sm:$0xff]  }
  0x43   :  { %358 = vmatprep.subr.bf16.mxu1 %v480_v13  ;;  %v71_v41 = vsub.s32 0, %v70_v40  ;;  %v67_v42 = vld [vmem:[%s720_s2] sm:$0x3]  ;;  %v75_v43 = vsub.s32 1, %v70_v40  ;;  %s627_s2 = smov [#allocation8]  }
  0x44   :  { %v180_v56 = vld [vmem:[%s722_s4] sm:$0x3]  ;;  %s411_s4 = sshll.u32 %s627_s2, 4  ;;  %s412_s4 = int_to_ptr.vmem [resolvable:$true] %s411_s4 }
  0x45   :  { %v72_v44 = vrot.slane %v67_v42, %v71_v41  ;;  %v76_v45 = vrot.slane %v67_v42, %v75_v43  ;;  %v185_v57 = vrot.slane %v180_v56, %v71_v41  ;;  %v189_v58 = vrot.slane %v180_v56, %v75_v43  ;;  %s593_s7 = scalar_lea.vmem %s412_s4, 256  ;;  %p598_p11 = scmp.lt.s32.totalorder %s412_s4, %s412_s4 }
  0x46   :  { %359 = vmatpush1.bf16.msra.mxu1 %v482_v14  ;;  %p594_p10 = scmp.ne.s32.totalorder %s412_s4, %s593_s7  ;;  %p599_p12 = scmp.lt.s32.totalorder %s593_s7, %s593_s7 }
  0x47   :  { %360 = vmatprep.subr.bf16.mxu1 %v483_v15 }
  0x48   :  { %p600_p13 = por %p599_p12, %p598_p11 }
  0x4a   :  { %361 = vmatpush1.bf16.msra.mxu1 %v485_v16  ;;  %p601_p0 = pnand %p600_p13, %p594_p10 }
  0x4b   :  { %362 = vmatprep.subr.bf16.mxu1 %v486_v17 }
  0x4e   :  { %363 = vmatpush1.bf16.msra.mxu1 %v488_v18 }
  0x4f   :  { %364 = vmatprep.subr.bf16.mxu1 %v489_v19 }
  0x52   :  { %365 = vmatpush1.bf16.msra.mxu1 %v491_v20 }
  0x53   :  { %366 = vmatprep.subr.bf16.mxu1 %v492_v21 }
  0x56   :  { %367 = vmatpush1.bf16.msra.mxu1 %v494_v22 }
  0x57   :  { %368 = vmatprep.subr.bf16.mxu1 %v495_v23 }
  0x5a   :  { %369 = vmatpush1.bf16.msra.mxu1 %v497_v24 }
  0x5b   :  { %370 = vmatprep.subr.bf16.mxu1 %v498_v25 }
  0x5e   :  { %371 = vmatpush1.bf16.msra.mxu1 %v500_v26 }
  0x5f   :  { %372 = vmatprep.subr.bf16.mxu1 %v501_v27 }
  0x62   :  { %373 = vmatpush1.bf16.msra.mxu1 %v503_v28 }
  0x63   :  { %374 = vmatprep.subr.bf16.mxu1 %v504_v29 }
  0x66   :  { %375 = vmatpush1.bf16.msra.mxu1 %v506_v30 }
  0x67   :  { %376 = vmatprep.subr.bf16.mxu1 %v507_v31 }
  0x6a   :  { %377 = vmatpush1.bf16.msra.mxu1 %v509_v32 }
  0x6b   :  { %378 = vmatprep.subr.bf16.mxu1 %v510_v33 }
  0x6e   :  { %379 = vmatpush1.bf16.msra.mxu1 %v512_v34 }
  0x6f   :  { %380 = vmatprep.subr.bf16.mxu1 %v513_v35 }
  0x72   :  { %381 = vmatpush1.bf16.msra.mxu1 %v515_v36 }
  0x73   :  { %382 = vmatprep.subr.bf16.mxu1 %v516_v37 }
  0x76   :  { %383 = vmatpush1.bf16.msra.mxu1 %v518_v38 }
 0x112   :  { %v137_v46 = vpop.f32.mrb[0].mxu0 }
 0x113   :  { %v138_v47 = vadd.f32 %v137_v46, %v72_v44  ;;  %v139_v48 = vpop.f32.mrb[1].mxu0 }
 0x114   :  { %v140_v49 = vadd.f32 %v139_v48, %v76_v45  ;;  %v141_v50 = vpop.f32.mrb[2].mxu0 }
 0x115   :  { %v144_v51 = vmax.f32 %v138_v47, 0.0  ;;  %v142_v52 = vpop.f32.mrb[3].mxu0 }
 0x116   :  { %v145_v53 = vmax.f32 %v140_v49, 0.0 }
 0x117   :  { %v146_v55 = vpack.c.bf16 %v144_v51, %v144_v51 }
 0x118   :  { %v147_v54 = vpack.c.bf16 %v145_v53, %v145_v53 }
 0x11a   :  { %384 = vmatprep.mubr.bf16.mxu1 %v147_v54 }
 0x11b   :  { %385 = vmatmul.mubr.bf16.vlgmr.msra.gmra.mrb[0].mxu1 %v146_v55 }
 0x1ee   :  { %v386_v59 = vpop.f32.mrb[0].mxu1 }
 0x1ef   :  { %v387_v60 = vadd.f32 %v386_v59, %v185_v57  ;;  %v388_v61 = vpop.f32.mrb[1].mxu1 }
 0x1f0   :  { %v389_v62 = vadd.f32 %v388_v61, %v189_v58  ;;  %v390_v63 = vpop.f32.mrb[2].mxu1 }
 0x1f1   :  { %v393_v0 = vsub.f32 0.0, %v387_v60  ;;  %v391_v1 = vpop.f32.mrb[3].mxu1 }
 0x1f2   :  { %v394_v2 = vsub.f32 0.0, %v389_v62 }
 0x1f3   :  { %v395_v3 = vmul.f32 1.442695, %v393_v0 }
 0x1f4   :  { %v397_v4 = vmul.f32 1.442695, %v394_v2 }
 0x1f5   :  { %519 = vpow2.f32 %v395_v3 }
 0x1f6   :  { %521 = vpow2.f32 %v397_v4 }
 0x1ff   :  { %v520_v5 = vpop.eup %519 }
 0x200   :  { %v522_v6 = vpop.eup %521  ;;  %v399_v7 = vadd.f32 1.0, %v520_v5 }
 0x201   :  { %v400_v8 = vadd.f32 1.0, %v522_v6 }
 0x202   :  { %523 = vrcp.f32 %v399_v7 }
 0x203   :  { %525 = vrcp.f32 %v400_v8 }
 0x20c   :  { %v524_v9 = vpop.eup %523 }
 0x20d   :  { %v526_v10 = vpop.eup %525  ;;  %403 = vst [vmem:[#allocation8] sm:$0xff] %v524_v9 }
 0x20e   :  { %404 = vst [vmem:[#allocation8 + $0x8] sm:$0xff] %v526_v10 }
 0x20f   :  { %604 = shalt.err (!%p601_p0)
}
 0x210   :  { %s605_s10 = scalar_lea.hbm %s723_s5, 256 }
 0x211   :  { %p606_p1 = scmp.ne.s32.totalorder %s723_s5, %s605_s10  ;;  %p609_p2 = scmp.lt.u32.totalorder %s605_s10, %s723_s5 }
 0x213   :  { %p611_p3 = pnand %p609_p2, %p606_p1 }
 0x215   :  { %614 = shalt.err (!%p611_p3)
}
 0x216   :  { %414 = dma.vmem_to_hbm [thread:$0]  %s412_s4, 256, %s723_s5, [#allocation4]  }
 0x217   :  { %619 = dma.done.wait [#allocation4], 256  }
 0x218   :  { %620 = vsyncadd [#allocation4], 4294967040 }
 0x219   :  { %418 = vsyncpa [#allocation3], 1 }
 0x21a   :  { %419 = vsyncpa [#allocation6], 1 }
 0x21b   :  { %420 = vsyncpa [#allocation4], 1 }

</bundles_post_ra>
